<compile_context>
chip_gen: v7x
topology: tpu7x:2x2x1
jax: 0.10.0
libtpu: 0.0.40
codegen_flags: <defaults>
</compile_context>

<pallas_src>
import math

import numpy as np

import jax
import jax.numpy as jnp
from jax.experimental import pallas as pl
from jax.experimental.pallas import tpu as pltpu

# ----------------------------- problem sizes --------------------------------
B = 2
IN_CH = 1
FRAMES = 16                      # frames_num (PyTorch dim 2)
N_MELS = 16                      # CFG.n_mels (PyTorch dim 3, bn0 channels)
PATCH = 4                        # stand-in encoder patch / stride
PATCH_DIM = IN_CH * PATCH * PATCH          # 16
F_ENC = 32                       # "in_features" of the backbone head
NUM_CLASSES = 24
MP = N_MELS // PATCH             # 4: segment / attention axis after encoder
TP = FRAMES // PATCH             # 4: axis reduced by torch.mean(x, dim=3)
RATIO = FRAMES // MP             # framewise interpolate ratio (4)
assert FRAMES % MP == 0          # -> pad_framewise_output is the identity here

BMP = B * MP                     # stacked head rows (8)
NPATCH = TP * BMP                # encoder rows (32), laid out TP-major
assert MP == 4 and BMP == 8      # roll-based segmented softmax hard-codes this

LANES = 128                      # lane-dense width of weight slab / outputs

# packed bf16 weight-slab row offsets (real-K blocks, back-to-back)
R_ENC = 0                        # rows [0,16):  patch-conv weights, lanes 0:F_ENC
R_FC1 = R_ENC + PATCH_DIM        # rows [16,48): fc1^T,              lanes 0:F_ENC
R_AC = R_FC1 + F_ENC             # rows [48,80): att^T lanes 0:24 | cla^T lanes 64:88
R_BIAS = R_AC + F_ENC            # rows [80,88): bias rows (enc, fc1, att|cla) + pad
W_ROWS = R_BIAS + 8              # 88 rows total (multiple of 8)
ATT_LANE = 0
CLA_LANE = 64

# packed output slab rows (per batch element)
ROW_FW_OUT = 0                   # rows [0,16)  : framewise_output
ROW_FW_LOG = FRAMES              # rows [16,32) : framewise_logit
ROW_CLIP = 2 * FRAMES            # row 32       : clipwise_output
ROW_LOGIT = 2 * FRAMES + 1       # row 33       : logit
OUT_ROWS = 2 * FRAMES + 8        # 40 rows (multiple of 8); rows 34:40 unused

# rhs row-blocks fed to the epilogue selection matmul
RHS_SIG, RHS_RAW, RHS_PSIG, RHS_PRAW = 0, BMP, 2 * BMP, 3 * BMP
RHS_ROWS = 4 * BMP               # 32

BN_EPS = 1e-5
# bn0 in eval: gamma=1, beta=0, running stats (0, 1) -> a pure scalar scale,
# folded into the encoder weights host-side.
# TODO(synk): a real checkpoint needs a per-mel-bin scale/shift fold instead of
# a scalar (gamma/beta/mean/var differ per channel).
BN_SCALE = 1.0 / math.sqrt(1.0 + BN_EPS)


# ----------------------------- fused Pallas kernel ---------------------------
def timm_sed_fused_kernel(p_ref, w_ref, sel_ref, o_ref):
    f32, bf16 = jnp.float32, jnp.bfloat16

    # ---- bn0 (folded) + stand-in patch-conv encoder + ReLU ------------------
    enc = jnp.dot(p_ref[...], w_ref[R_ENC:R_ENC + PATCH_DIM, :],
                  preferred_element_type=f32)                     # (32, 128)
    enc = jnp.maximum(enc + w_ref[R_BIAS:R_BIAS + 1, :].astype(f32), 0.0)

    # ---- torch.mean(x, dim=3): average the TP time-patch slices -------------
    # rows are laid out TP-major -> each slice is a sublane-aligned (8,128) tile
    x = enc[0:BMP, :]
    for tp in range(1, TP):
        x = x + enc[tp * BMP:(tp + 1) * BMP, :]
    x = x * (1.0 / TP)                                            # (8,128), rows=(b,mp)

    # ---- max_pool1d + avg_pool1d (k=3, s=1, p=1) along MP, per batch --------
    row = jax.lax.broadcasted_iota(jnp.int32, (BMP, LANES), 0)
    is_first = (row % MP) == 0                                    # segment 0 per batch
    is_last = (row % MP) == (MP - 1)                              # last segment per batch
    prev = pltpu.roll(x, 1, 0)                                    # prev[i] = x[i-1 mod 8]
    nxt = pltpu.roll(x, BMP - 1, 0)                               # nxt[i]  = x[i+1 mod 8]
    x_max = jnp.maximum(jnp.maximum(jnp.where(is_first, -jnp.inf, prev), x),
                        jnp.where(is_last, -jnp.inf, nxt))        # max pad = -inf
    x_avg = (jnp.where(is_first, 0.0, prev) + x +
             jnp.where(is_last, 0.0, nxt)) * (1.0 / 3.0)          # count_include_pad=True
    x = x_max + x_avg                                             # dropout(eval) = id

    # ---- fc1 + ReLU (real K = F_ENC, bf16 MXU operands) ---------------------
    h = jnp.dot(x[:, 0:F_ENC].astype(bf16), w_ref[R_FC1:R_FC1 + F_ENC, :],
                preferred_element_type=f32)
    h = jnp.maximum(h + w_ref[R_BIAS + 1:R_BIAS + 2, :].astype(f32), 0.0)   # (8,128)

    # ---- AttBlockV2: ONE fused att|cla matmul --------------------------------
    ac = jnp.dot(h[:, 0:F_ENC].astype(bf16), w_ref[R_AC:R_AC + F_ENC, :],
                 preferred_element_type=f32)
    ac = ac + w_ref[R_BIAS + 2:R_BIAS + 3, :].astype(f32)   # att @ lanes 0:24, cla @ 64:88
    raw = pltpu.roll(ac, LANES - CLA_LANE, axis=1)           # cla logits -> lanes 0:24
    # softmax(tanh(att)) over segments: tanh is bounded so the max-shift is not
    # needed for stability; lanes >= NUM_CLASSES carry harmless junk (sliced off
    # by the wrapper).
    e = jnp.exp(jnp.tanh(ac))                                 # (8,128), values in [1/e, e]
    sig = jax.nn.sigmoid(raw)                                 # segmentwise output

    # exact segmented softmax denominator over each batch's MP=4 rows (XLU rolls)
    a = e + pltpu.roll(e, 1, 0)
    s = a + pltpu.roll(a, 2, 0)                               # rows 3,7: clean group sums
    t = jnp.where((row % MP) == (MP - 1), s, 0.0)
    u = t + pltpu.roll(t, BMP - 1, 0)
    denom = u + pltpu.roll(u, BMP - 2, 0)                     # group sum on every row
    norm_att = e * pl.reciprocal(denom, approx=True)

    # ---- epilogue: one 0/1-selection matmul builds the whole output slab -----
    #   rows 0:16   framewise_output (repeat sig by RATIO)
    #   rows 16:32  framewise_logit  (repeat raw by RATIO)
    #   row  32     clipwise_output  (sum_mp norm_att*sig)
    #   row  33     logit            (sum_mp norm_att*raw)
    rhs = jnp.concatenate([sig, raw, norm_att * sig, norm_att * raw],
                          axis=0).astype(bf16)                # (32, 128)
    o_ref[...] = jnp.dot(sel_ref[...], rhs, preferred_element_type=f32)   # (80,128)


# ----------------------------- pallas_call wrapper ---------------------------
def run_fused(patches, w_slab, sel):
    cost = pl.CostEstimate(
        flops=2 * (NPATCH * PATCH_DIM * LANES + 2 * BMP * F_ENC * LANES
                   + B * OUT_ROWS * RHS_ROWS * LANES),
        transcendentals=4 * BMP * LANES,
        bytes_accessed=2 * (NPATCH * PATCH_DIM + W_ROWS * LANES
                            + B * OUT_ROWS * RHS_ROWS) + 4 * B * OUT_ROWS * LANES,
    )
    # No grid: 1-step grids only add per-step bookkeeping.  Whole arrays live in
    # VMEM (a few tens of KB, far below any generation's VMEM limit).
    # TODO(synk): if B grows, switch to a batch-tiled "parallel" grid so v7x's
    # two TensorCores can split batches.
    return pl.pallas_call(
        timm_sed_fused_kernel,
        out_shape=jax.ShapeDtypeStruct((B * OUT_ROWS, LANES), jnp.float32),
        in_specs=[
            pl.BlockSpec(memory_space=pltpu.MemorySpace.VMEM),
            pl.BlockSpec(memory_space=pltpu.MemorySpace.VMEM),
            pl.BlockSpec(memory_space=pltpu.MemorySpace.VMEM),
        ],
        out_specs=pl.BlockSpec(memory_space=pltpu.MemorySpace.VMEM),
        cost_estimate=cost,
    )(patches, w_slab, sel)


# ----------------------------- JAX glue --------------------------------------
def timm_sed_forward(x, params):
    # x: (B, IN_CH, FRAMES, N_MELS) -- NCHW as in PyTorch.  bn0(eval) is folded
    # into the packed encoder weights; the transpose(1,3)/transpose(2,3)
    # shuffles + patchify collapse into one reshape/transpose laying patches
    # out TP-major (no lane padding -> 8x less input DMA than before).
    xr = x.reshape(B, IN_CH, TP, PATCH, MP, PATCH)              # [b, c, tp, pt, mp, pm]
    patches = jnp.transpose(xr, (2, 0, 4, 1, 5, 3))             # [tp, b, mp, c, pm, pt]
    patches = patches.reshape(NPATCH, PATCH_DIM).astype(jnp.bfloat16)

    out = run_fused(patches, params["w_slab"], params["sel"])   # (80, 128) f32
    out = out.reshape(B, OUT_ROWS, LANES)

    return {
        "framewise_output": out[:, ROW_FW_OUT:ROW_FW_OUT + FRAMES, 0:NUM_CLASSES],
        "clipwise_output": out[:, ROW_CLIP, 0:NUM_CLASSES],
        "logit": out[:, ROW_LOGIT, 0:NUM_CLASSES],
        "framewise_logit": out[:, ROW_FW_LOG:ROW_FW_LOG + FRAMES, 0:NUM_CLASSES],
    }


# ----------------------------- deterministic params --------------------------
def xavier_uniform(key, shape, fan_in, fan_out):
    bound = math.sqrt(6.0 / (fan_in + fan_out))
    return jax.random.uniform(key, shape, jnp.float32, -bound, bound)


def build_selection_matrix():
    """(B*OUT_ROWS, RHS_ROWS) 0/1 matrix: framewise repeat + clip/logit sums."""
    sel = np.zeros((B * OUT_ROWS, RHS_ROWS), np.float32)
    for b in range(B):
        base = b * OUT_ROWS
        for f in range(FRAMES):
            sel[base + ROW_FW_OUT + f, RHS_SIG + b * MP + f // RATIO] = 1.0
            sel[base + ROW_FW_LOG + f, RHS_RAW + b * MP + f // RATIO] = 1.0
        for mp in range(MP):
            sel[base + ROW_CLIP, RHS_PSIG + b * MP + mp] = 1.0
            sel[base + ROW_LOGIT, RHS_PRAW + b * MP + mp] = 1.0
    return jnp.asarray(sel, jnp.bfloat16)


def init_params(key):
    """Build the packed bf16 parameter slab (88, 128) + epilogue selection matrix."""
    k_enc, k_fc1, k_att, k_cla = jax.random.split(key, 4)
    enc_w = xavier_uniform(k_enc, (PATCH_DIM, F_ENC), PATCH_DIM, F_ENC)      # stand-in conv (in, out)
    fc1_w = xavier_uniform(k_fc1, (F_ENC, F_ENC), F_ENC, F_ENC)              # torch Linear (out, in)
    att_w = xavier_uniform(k_att, (NUM_CLASSES, F_ENC), F_ENC, NUM_CLASSES)  # Conv1d k=1 (out, in)
    cla_w = xavier_uniform(k_cla, (NUM_CLASSES, F_ENC), F_ENC, NUM_CLASSES)
    # init_layer fills every bias with 0 -> the three bias rows stay zero.

    slab = jnp.zeros((W_ROWS, LANES), jnp.float32)
    slab = slab.at[R_ENC:R_ENC + PATCH_DIM, 0:F_ENC].set(enc_w * BN_SCALE)   # bn0 folded
    slab = slab.at[R_FC1:R_FC1 + F_ENC, 0:F_ENC].set(fc1_w.T)                # x @ W^T
    slab = slab.at[R_AC:R_AC + F_ENC, ATT_LANE:ATT_LANE + NUM_CLASSES].set(att_w.T)
    slab = slab.at[R_AC:R_AC + F_ENC, CLA_LANE:CLA_LANE + NUM_CLASSES].set(cla_w.T)
    return {"w_slab": slab.astype(jnp.bfloat16), "sel": build_selection_matrix()}


# ----------------------------- main ------------------------------------------
if __name__ == "__main__":
    key = jax.random.PRNGKey(0)
    k_in, k_p = jax.random.split(key)
    x = jax.random.normal(k_in, (B, IN_CH, FRAMES, N_MELS), jnp.float32)
    params = init_params(k_p)

    fwd = jax.jit(lambda inp: timm_sed_forward(inp, params))
    out = jax.block_until_ready(fwd(x))

    assert out["framewise_output"].shape == (B, FRAMES, NUM_CLASSES)
    assert out["clipwise_output"].shape == (B, NUM_CLASSES)
    assert out["logit"].shape == (B, NUM_CLASSES)
    assert out["framewise_logit"].shape == (B, FRAMES, NUM_CLASSES)
    assert bool(jnp.all(jnp.isfinite(out["framewise_output"])))
    assert bool(jnp.all(jnp.isfinite(out["framewise_logit"])))
    assert bool(jnp.all(out["clipwise_output"] >= 0))
    assert bool(jnp.all(out["clipwise_output"] <= 1))

    print("KERNEL_OK")
</pallas_src>

<mosaic_0001>
module attributes {stable_mosaic.version = 11 : i64} {
  func.func @timm_sed_fused_kernel(%arg0: memref<32x16xbf16, #tpu.memory_space<vmem>>, %arg1: memref<88x128xbf16, #tpu.memory_space<vmem>>, %arg2: memref<80x32xbf16, #tpu.memory_space<vmem>>, %arg3: memref<80x128xf32, #tpu.memory_space<vmem>>) attributes {dimension_semantics = [], scalar_prefetch = 0 : i64, scratch_operands = 0 : i64, tpu.core_type = #tpu.core_type<tc>} {
    %c0 = arith.constant 0 : index
    %c0_0 = arith.constant 0 : index
    %0 = vector.load %arg0[%c0, %c0_0] : memref<32x16xbf16, #tpu.memory_space<vmem>>, vector<32x16xbf16>
    %c0_1 = arith.constant 0 : index
    %c0_2 = arith.constant 0 : index
    %1 = vector.load %arg1[%c0_1, %c0_2] : memref<88x128xbf16, #tpu.memory_space<vmem>>, vector<16x128xbf16>
    %cst = arith.constant dense<0.000000e+00> : vector<32x128xf32>
    %2 = tpu.matmul %0, %1, %cst {dimension_numbers = #tpu.dot_dimension_numbers<[1], [0], [0], [1], [0, 0, 1, 1], [], []>} : vector<32x16xbf16>, vector<16x128xbf16>, vector<32x128xf32> -> vector<32x128xf32>
    %c80 = arith.constant 80 : index
    %c0_3 = arith.constant 0 : index
    %3 = vector.load %arg1[%c80, %c0_3] : memref<88x128xbf16, #tpu.memory_space<vmem>>, vector<1x128xbf16>
    %4 = arith.extf %3 : vector<1x128xbf16> to vector<1x128xf32>
    %5 = vector.broadcast %4 : vector<1x128xf32> to vector<32x128xf32>
    %6 = arith.addf %2, %5 : vector<32x128xf32>
    %cst_4 = arith.constant 0.000000e+00 : f32
    %7 = vector.broadcast %cst_4 : f32 to vector<32x128xf32>
    %8 = arith.maximumf %6, %7 : vector<32x128xf32>
    %9 = vector.extract_strided_slice %8 {offsets = [0, 0], sizes = [8, 128], strides = [1, 1]} : vector<32x128xf32> to vector<8x128xf32>
    %10 = vector.extract_strided_slice %8 {offsets = [8, 0], sizes = [8, 128], strides = [1, 1]} : vector<32x128xf32> to vector<8x128xf32>
    %11 = arith.addf %9, %10 : vector<8x128xf32>
    %12 = vector.extract_strided_slice %8 {offsets = [16, 0], sizes = [8, 128], strides = [1, 1]} : vector<32x128xf32> to vector<8x128xf32>
    %13 = arith.addf %11, %12 : vector<8x128xf32>
    %14 = vector.extract_strided_slice %8 {offsets = [24, 0], sizes = [8, 128], strides = [1, 1]} : vector<32x128xf32> to vector<8x128xf32>
    %15 = arith.addf %13, %14 : vector<8x128xf32>
    %cst_5 = arith.constant 2.500000e-01 : f32
    %16 = vector.broadcast %cst_5 : f32 to vector<8x128xf32>
    %17 = arith.mulf %15, %16 : vector<8x128xf32>
    %18 = tpu.iota {dimensions = array<i32: 0>} : vector<8x128xi32>
    %c4_i32 = arith.constant 4 : i32
    %c0_i32 = arith.constant 0 : i32
    %19 = arith.cmpi eq, %c4_i32, %c0_i32 : i32
    %c1_i32 = arith.constant 1 : i32
    %20 = arith.select %19, %c1_i32, %c4_i32 : i32
    %21 = vector.broadcast %20 : i32 to vector<8x128xi32>
    %22 = arith.remsi %18, %21 : vector<8x128xi32>
    %c0_i32_6 = arith.constant 0 : i32
    %23 = vector.broadcast %c0_i32_6 : i32 to vector<8x128xi32>
    %24 = arith.cmpi ne, %22, %23 : vector<8x128xi32>
    %c0_i32_7 = arith.constant 0 : i32
    %25 = vector.broadcast %c0_i32_7 : i32 to vector<8x128xi32>
    %26 = arith.cmpi slt, %22, %25 : vector<8x128xi32>
    %c0_i32_8 = arith.constant 0 : i32
    %27 = arith.cmpi slt, %20, %c0_i32_8 : i32
    %28 = vector.broadcast %27 : i1 to vector<8x128xi1>
    %29 = vector.broadcast %28 : vector<8x128xi1> to vector<8x128xi1>
    %30 = arith.xori %26, %29 : vector<8x128xi1>
    %31 = arith.andi %30, %24 : vector<8x128xi1>
    %32 = vector.broadcast %20 : i32 to vector<8x128xi32>
    %33 = arith.addi %22, %32 : vector<8x128xi32>
    %34 = arith.select %31, %33, %22 : vector<8x128xi1>, vector<8x128xi32>
    %c0_i32_9 = arith.constant 0 : i32
    %35 = vector.broadcast %c0_i32_9 : i32 to vector<8x128xi32>
    %36 = arith.cmpi eq, %34, %35 : vector<8x128xi32>
    %c4_i32_10 = arith.constant 4 : i32
    %c0_i32_11 = arith.constant 0 : i32
    %37 = arith.cmpi eq, %c4_i32_10, %c0_i32_11 : i32
    %c1_i32_12 = arith.constant 1 : i32
    %38 = arith.select %37, %c1_i32_12, %c4_i32_10 : i32
    %39 = vector.broadcast %38 : i32 to vector<8x128xi32>
    %40 = arith.remsi %18, %39 : vector<8x128xi32>
    %c0_i32_13 = arith.constant 0 : i32
    %41 = vector.broadcast %c0_i32_13 : i32 to vector<8x128xi32>
    %42 = arith.cmpi ne, %40, %41 : vector<8x128xi32>
    %c0_i32_14 = arith.constant 0 : i32
    %43 = vector.broadcast %c0_i32_14 : i32 to vector<8x128xi32>
    %44 = arith.cmpi slt, %40, %43 : vector<8x128xi32>
    %c0_i32_15 = arith.constant 0 : i32
    %45 = arith.cmpi slt, %38, %c0_i32_15 : i32
    %46 = vector.broadcast %45 : i1 to vector<8x128xi1>
    %47 = vector.broadcast %46 : vector<8x128xi1> to vector<8x128xi1>
    %48 = arith.xori %44, %47 : vector<8x128xi1>
    %49 = arith.andi %48, %42 : vector<8x128xi1>
    %50 = vector.broadcast %38 : i32 to vector<8x128xi32>
    %51 = arith.addi %40, %50 : vector<8x128xi32>
    %52 = arith.select %49, %51, %40 : vector<8x128xi1>, vector<8x128xi32>
    %c3_i32 = arith.constant 3 : i32
    %53 = vector.broadcast %c3_i32 : i32 to vector<8x128xi32>
    %54 = arith.cmpi eq, %52, %53 : vector<8x128xi32>
    %c1_i32_16 = arith.constant 1 : i32
    %55 = tpu.dynamic_rotate %17 by %c1_i32_16 dim 0 : vector<8x128xf32>, i32 -> vector<8x128xf32>
    %c7_i32 = arith.constant 7 : i32
    %56 = tpu.dynamic_rotate %17 by %c7_i32 dim 0 : vector<8x128xf32>, i32 -> vector<8x128xf32>
    %cst_17 = arith.constant 0xFF800000 : f32
    %57 = vector.broadcast %cst_17 : f32 to vector<8x128xf32>
    %58 = arith.select %36, %57, %55 : vector<8x128xi1>, vector<8x128xf32>
    %59 = arith.maximumf %58, %17 : vector<8x128xf32>
    %cst_18 = arith.constant 0xFF800000 : f32
    %60 = vector.broadcast %cst_18 : f32 to vector<8x128xf32>
    %61 = arith.select %54, %60, %56 : vector<8x128xi1>, vector<8x128xf32>
    %62 = arith.maximumf %59, %61 : vector<8x128xf32>
    %cst_19 = arith.constant 0.000000e+00 : f32
    %63 = vector.broadcast %cst_19 : f32 to vector<8x128xf32>
    %64 = arith.select %36, %63, %55 : vector<8x128xi1>, vector<8x128xf32>
    %65 = arith.addf %64, %17 : vector<8x128xf32>
    %cst_20 = arith.constant 0.000000e+00 : f32
    %66 = vector.broadcast %cst_20 : f32 to vector<8x128xf32>
    %67 = arith.select %54, %66, %56 : vector<8x128xi1>, vector<8x128xf32>
    %68 = arith.addf %65, %67 : vector<8x128xf32>
    %cst_21 = arith.constant 0.333333343 : f32
    %69 = vector.broadcast %cst_21 : f32 to vector<8x128xf32>
    %70 = arith.mulf %68, %69 : vector<8x128xf32>
    %71 = arith.addf %62, %70 : vector<8x128xf32>
    %72 = vector.extract_strided_slice %71 {offsets = [0, 0], sizes = [8, 32], strides = [1, 1]} : vector<8x128xf32> to vector<8x32xf32>
    %73 = arith.truncf %72 : vector<8x32xf32> to vector<8x32xbf16>
    %c16 = arith.constant 16 : index
    %c0_22 = arith.constant 0 : index
    %74 = vector.load %arg1[%c16, %c0_22] : memref<88x128xbf16, #tpu.memory_space<vmem>>, vector<32x128xbf16>
    %cst_23 = arith.constant dense<0.000000e+00> : vector<8x128xf32>
    %75 = tpu.matmul %73, %74, %cst_23 {dimension_numbers = #tpu.dot_dimension_numbers<[1], [0], [0], [1], [0, 0, 1, 1], [], []>} : vector<8x32xbf16>, vector<32x128xbf16>, vector<8x128xf32> -> vector<8x128xf32>
    %c81 = arith.constant 81 : index
    %c0_24 = arith.constant 0 : index
    %76 = vector.load %arg1[%c81, %c0_24] : memref<88x128xbf16, #tpu.memory_space<vmem>>, vector<1x128xbf16>
    %77 = arith.extf %76 : vector<1x128xbf16> to vector<1x128xf32>
    %78 = vector.broadcast %77 : vector<1x128xf32> to vector<8x128xf32>
    %79 = arith.addf %75, %78 : vector<8x128xf32>
    %cst_25 = arith.constant 0.000000e+00 : f32
    %80 = vector.broadcast %cst_25 : f32 to vector<8x128xf32>
    %81 = arith.maximumf %79, %80 : vector<8x128xf32>
    %82 = vector.extract_strided_slice %81 {offsets = [0, 0], sizes = [8, 32], strides = [1, 1]} : vector<8x128xf32> to vector<8x32xf32>
    %83 = arith.truncf %82 : vector<8x32xf32> to vector<8x32xbf16>
    %c48 = arith.constant 48 : index
    %c0_26 = arith.constant 0 : index
    %84 = vector.load %arg1[%c48, %c0_26] : memref<88x128xbf16, #tpu.memory_space<vmem>>, vector<32x128xbf16>
    %cst_27 = arith.constant dense<0.000000e+00> : vector<8x128xf32>
    %85 = tpu.matmul %83, %84, %cst_27 {dimension_numbers = #tpu.dot_dimension_numbers<[1], [0], [0], [1], [0, 0, 1, 1], [], []>} : vector<8x32xbf16>, vector<32x128xbf16>, vector<8x128xf32> -> vector<8x128xf32>
    %c82 = arith.constant 82 : index
    %c0_28 = arith.constant 0 : index
    %86 = vector.load %arg1[%c82, %c0_28] : memref<88x128xbf16, #tpu.memory_space<vmem>>, vector<1x128xbf16>
    %87 = arith.extf %86 : vector<1x128xbf16> to vector<1x128xf32>
    %88 = vector.broadcast %87 : vector<1x128xf32> to vector<8x128xf32>
    %89 = arith.addf %85, %88 : vector<8x128xf32>
    %c64_i32 = arith.constant 64 : i32
    %90 = tpu.dynamic_rotate %89 by %c64_i32 dim 1 : vector<8x128xf32>, i32 -> vector<8x128xf32>
    %91 = math.tanh %89 : vector<8x128xf32>
    %92 = math.exp %91 : vector<8x128xf32>
    %93 = arith.negf %90 : vector<8x128xf32>
    %94 = math.exp %93 : vector<8x128xf32>
    %cst_29 = arith.constant 1.000000e+00 : f32
    %95 = vector.broadcast %cst_29 : f32 to vector<8x128xf32>
    %96 = arith.addf %95, %94 : vector<8x128xf32>
    %97 = arith.divf %95, %96 : vector<8x128xf32>
    %c1_i32_30 = arith.constant 1 : i32
    %98 = tpu.dynamic_rotate %92 by %c1_i32_30 dim 0 : vector<8x128xf32>, i32 -> vector<8x128xf32>
    %99 = arith.addf %92, %98 : vector<8x128xf32>
    %c2_i32 = arith.constant 2 : i32
    %100 = tpu.dynamic_rotate %99 by %c2_i32 dim 0 : vector<8x128xf32>, i32 -> vector<8x128xf32>
    %101 = arith.addf %99, %100 : vector<8x128xf32>
    %c4_i32_31 = arith.constant 4 : i32
    %c0_i32_32 = arith.constant 0 : i32
    %102 = arith.cmpi eq, %c4_i32_31, %c0_i32_32 : i32
    %c1_i32_33 = arith.constant 1 : i32
    %103 = arith.select %102, %c1_i32_33, %c4_i32_31 : i32
    %104 = vector.broadcast %103 : i32 to vector<8x128xi32>
    %105 = arith.remsi %18, %104 : vector<8x128xi32>
    %c0_i32_34 = arith.constant 0 : i32
    %106 = vector.broadcast %c0_i32_34 : i32 to vector<8x128xi32>
    %107 = arith.cmpi ne, %105, %106 : vector<8x128xi32>
    %c0_i32_35 = arith.constant 0 : i32
    %108 = vector.broadcast %c0_i32_35 : i32 to vector<8x128xi32>
    %109 = arith.cmpi slt, %105, %108 : vector<8x128xi32>
    %c0_i32_36 = arith.constant 0 : i32
    %110 = arith.cmpi slt, %103, %c0_i32_36 : i32
    %111 = vector.broadcast %110 : i1 to vector<8x128xi1>
    %112 = vector.broadcast %111 : vector<8x128xi1> to vector<8x128xi1>
    %113 = arith.xori %109, %112 : vector<8x128xi1>
    %114 = arith.andi %113, %107 : vector<8x128xi1>
    %115 = vector.broadcast %103 : i32 to vector<8x128xi32>
    %116 = arith.addi %105, %115 : vector<8x128xi32>
    %117 = arith.select %114, %116, %105 : vector<8x128xi1>, vector<8x128xi32>
    %c3_i32_37 = arith.constant 3 : i32
    %118 = vector.broadcast %c3_i32_37 : i32 to vector<8x128xi32>
    %119 = arith.cmpi eq, %117, %118 : vector<8x128xi32>
    %cst_38 = arith.constant 0.000000e+00 : f32
    %120 = vector.broadcast %cst_38 : f32 to vector<8x128xf32>
    %121 = arith.select %119, %101, %120 : vector<8x128xi1>, vector<8x128xf32>
    %c7_i32_39 = arith.constant 7 : i32
    %122 = tpu.dynamic_rotate %121 by %c7_i32_39 dim 0 : vector<8x128xf32>, i32 -> vector<8x128xf32>
    %123 = arith.addf %121, %122 : vector<8x128xf32>
    %c6_i32 = arith.constant 6 : i32
    %124 = tpu.dynamic_rotate %123 by %c6_i32 dim 0 : vector<8x128xf32>, i32 -> vector<8x128xf32>
    %125 = arith.addf %123, %124 : vector<8x128xf32>
    %126 = tpu.reciprocal %125 {approx = true} : vector<8x128xf32> -> vector<8x128xf32>
    %127 = arith.mulf %92, %126 : vector<8x128xf32>
    %128 = arith.mulf %127, %97 : vector<8x128xf32>
    %129 = arith.mulf %127, %90 : vector<8x128xf32>
    %130 = tpu.concatenate %97, %90, %128, %129 in 0 : vector<8x128xf32>, vector<8x128xf32>, vector<8x128xf32>, vector<8x128xf32> -> vector<32x128xf32>
    %131 = arith.truncf %130 : vector<32x128xf32> to vector<32x128xbf16>
    %c0_40 = arith.constant 0 : index
    %c0_41 = arith.constant 0 : index
    %132 = vector.load %arg2[%c0_40, %c0_41] : memref<80x32xbf16, #tpu.memory_space<vmem>>, vector<80x32xbf16>
    %cst_42 = arith.constant dense<0.000000e+00> : vector<80x128xf32>
    %133 = tpu.matmul %132, %131, %cst_42 {dimension_numbers = #tpu.dot_dimension_numbers<[1], [0], [0], [1], [0, 0, 1, 1], [], []>} : vector<80x32xbf16>, vector<32x128xbf16>, vector<80x128xf32> -> vector<80x128xf32>
    %c0_43 = arith.constant 0 : index
    %c0_44 = arith.constant 0 : index
    %134 = vector.load %arg3[%c0_43, %c0_44] : memref<80x128xf32, #tpu.memory_space<vmem>>, vector<80x128xf32>
    tpu.vector_store %arg3[%c0_43, %c0_44], %133 {strides = array<i32>} : memref<80x128xf32, #tpu.memory_space<vmem>>, vector<80x128xf32>,
    return
  }
}

</mosaic_0001>

<bundles_post_ra>
// kernel: _lambda_.1
= control target key start
LH: loop header
LB: loop body
LE: loop exit
PB: predicated region body
PF: predicated region fallthrough
CT: control target
= control target key end

     0   :  { %vm43_vm0 = vcmask 130048   ;;  %v543_v4 = vmov 0.0   ;;  %vm544_vm1 = vmmov 0   ;;  %v23_v6 = vlaneseq  ;;  %s545_s29 = smov 64   ;;  %s677_s1 = inlined_call_operand.vmem [shape: bf16[88,128], index: 1, kind: input, shape index: {}]   ;;  %s678_s0 = inlined_call_operand.vmem [shape: bf16[32,16], index: 0, kind: input, shape index: {}]   ;;  %s679_s2 = inlined_call_operand.vmem [shape: bf16[80,32], index: 2, kind: input, shape index: {}]   ;;  %s680_s3 = inlined_call_operand.vmem [shape: f32[80,128], index: 3, kind: output, shape index: {}]  }
   0x1   :  { %v521_v0 = vld [vmem:[%s677_s1] sm:$0xff]   ;;  %v523_v2 = vld [vmem:[%s678_s0 + $0x8] sm:$0xff]   ;;  %474 = vmatprep.subr.bf16.mxu1 %v543_v4  ;;  %478 = vmatprep.mubr.msk.bf16.mxu1 %vm544_vm1, %v543_v4  ;;  %v525_v5 = vld [vmem:[%s677_s1 + $0x10] sm:$0xff]   ;;  %vm156_vm4 = vcmask 261120  }
   0x2   :  { %v522_v1 = vld [vmem:[%s678_s0] sm:$0xff]   ;;  %468 = vmatprep.subr.bf16.mxu0 %v521_v0  ;;  %v524_v3 = vld [vmem:[%s677_s1 + $0x8] sm:$0xff]   ;;  %v24_v7 = vshrl.u32 %v23_v6, 7  ;;  %v526_v43 = vld [vmem:[%s677_s1 + $0x18] sm:$0xff]  }
   0x3   :  { %469 = vmatpush3.bf16.msra.mxu0 %v521_v0  ;;  %470 = vmatprep.mubr.msk.bf16.mxu0 %vm43_vm0, %v522_v1  ;;  %v21_v8 = vld [vmem:[%s677_s1 + $0x28] sm:$0x1]  ;;  %v527_v44 = vld [vmem:[%s677_s1 + $0x20] sm:$0xff]   ;;  %v206_v54 = vld [vmem:[%s677_s1 + $0x28] sm:$0x2] }
   0x4   :  { %475 = vmatpush3.bf16.msra.mxu1 %v524_v3  ;;  %482 = vmatprep.subr.bf16.mxu0 %v543_v4  ;;  %v22_v9 = vunpack.c.l.bf16 %v21_v8  ;;  %v25_v10 = vsub.s32 0, %v24_v7  ;;  %v113_v26 = vand.u32 3, %v24_v7  ;;  %v142_v45 = vsub.s32 1, %v24_v7 }
   0x5   :  { %476 = vmatprep.subr.bf16.mxu1 %v543_v4  ;;  %v207_v55 = vunpack.c.l.bf16 %v206_v54  ;;  %v210_v56 = vsub.s32 2, %v24_v7 }
   0x6   :  { %471 = vmatmul.mubr.msk.bf16.vlgmr.msra.gmra.mrb[0].mxu0 %vm43_vm0, %v523_v2  ;;  %v26_v11 = vrot.slane %v22_v9, %v25_v10  ;;  %vm121_vm2 = vcmp.eq.s32.totalorder %v113_v26, 0  ;;  %vm592_vm3 = vcmp.eq.s32.totalorder %v113_v26, 3  ;;  %v143_v46 = vrot.slane %v22_v9, %v142_v45  ;;  %v531_v26 = vld [vmem:[%s679_s2 + $0x8] sm:$0xff]  }
   0x7   :  { %486 = vmatprep.mubr.msk.bf16.mxu0 %vm544_vm1, %v543_v4  ;;  %483 = vmatpush3.bf16.msra.mxu0 %v526_v43  ;;  %v211_v57 = vrot.slane %v207_v55, %v210_v56 }
   0x8   :  { %477 = vmatpush3.bf16.msra.mxu1 %v525_v5  ;;  %484 = vmatprep.subr.bf16.mxu0 %v543_v4 }
   0x9   :  { %514 = vmatprep.subr.bf16.mxu1 %v543_v4 }
   0xb   :  { %485 = vmatpush3.bf16.msra.mxu0 %v527_v44 }
   0xc   :  { %490 = vmatprep.subr.bf16.mxu0 %v543_v4 }
  0xd9   :  { %v472_v12 = vpop.f32.mrb[0].mxu0 }
  0xda   :  { %v84_v13 = vpop.f32.mrb[1].mxu0  ;;  %v93_v17 = vadd.f32 %v472_v12, %v26_v11 }
  0xdb   :  { %v85_v14 = vadd.f32 %v84_v13, %v26_v11  ;;  %v473_v15 = vpop.f32.mrb[2].mxu0 }
  0xdc   :  { %v87_v16 = vpop.f32.mrb[3].mxu0  ;;  %v96_v20 = vadd.f32 %v473_v15, %v26_v11  ;;  %v101_v22 = vmax.f32 %v93_v17, 0.0 }
  0xdd   :  { %v88_v18 = vadd.f32 %v87_v16, %v26_v11  ;;  %v99_v19 = vmax.f32 %v85_v14, 0.0 }
  0xde   :  { %v102_v24 = vmax.f32 %v96_v20, 0.0 }
  0xdf   :  { %v100_v21 = vmax.f32 %v88_v18, 0.0 }
  0xe1   :  { %v103_v23 = vadd.f32 %v100_v21, %v99_v19 }
  0xe3   :  { %v104_v25 = vadd.f32 %v103_v23, %v101_v22  ;;  %v528_v23 = vld [vmem:[%s679_s2 + $0x10] sm:$0xff]  }
  0xe5   :  { %v105_v27 = vadd.f32 %v104_v25, %v102_v24  ;;  %v529_v24 = vld [vmem:[%s679_s2] sm:$0xff]   ;;  %v530_v25 = vld [vmem:[%s679_s2 + $0x18] sm:$0xff]  }
  0xe7   :  { %v106_v28 = vmul.f32 0.25, %v105_v27  ;;  %v532_v27 = vld [vmem:[%s679_s2 + $0x20] sm:$0xff]  }
  0xe9   :  { %v123_v29 = vrot.slane %v106_v28, 7  ;;  %v124_v30 = vrot.slane %v106_v28, 1 }
  0xeb   :  { %v125_v32 = vsel %vm121_vm2, -inf, %v123_v29  ;;  %v129_v33 = vsel %vm121_vm2, 0.0, %v123_v29  ;;  %v131_v36 = vsel %vm592_vm3, 0.0, %v124_v30  ;;  %v127_v38 = vsel %vm592_vm3, -inf, %v124_v30 }
  0xec   :  { %v126_v34 = vmax.f32 %v125_v32, %v106_v28  ;;  %v130_v35 = vadd.f32 %v129_v33, %v106_v28 }
  0xee   :  { %v132_v37 = vadd.f32 %v131_v36, %v130_v35  ;;  %v128_v39 = vmax.f32 %v126_v34, %v127_v38 }
  0xf0   :  { %v133_v40 = vmul.f32 0.33333334, %v132_v37 }
  0xf2   :  { %v134_v41 = vadd.f32 %v133_v40, %v128_v39 }
  0xf4   :  { %v135_v42 = vpack.c.bf16 %v134_v41, %v134_v41 }
  0xf6   :  { %479 = vmatmul.mubr.msk.bf16.vlgmr.msra.gmra.mrb[0].mxu1 %vm156_vm4, %v135_v42 }
  0xf7   :  { %502 = vmatprep.mubr.msk.bf16.mxu1 %vm544_vm1, %v543_v4 }
 0x1c9   :  { %v194_v47 = vpop.f32.mrb[0].mxu1 }
 0x1ca   :  { %v195_v48 = vadd.f32 %v194_v47, %v143_v46  ;;  %v480_v49 = vpop.f32.mrb[1].mxu1 }
 0x1cb   :  { %v197_v50 = vpop.f32.mrb[2].mxu1 }
 0x1cc   :  { %v200_v51 = vmax.f32 %v195_v48, 0.0  ;;  %v481_v52 = vpop.f32.mrb[3].mxu1 }
 0x1ce   :  { %v201_v53 = vpack.c.bf16 %v200_v51, %v200_v51 }
 0x1d0   :  { %487 = vmatmul.mubr.msk.bf16.vlgmr.msra.gmra.mrb[4].mxu0 %vm156_vm4, %v201_v53 }
 0x1d1   :  { %494 = vmatprep.mubr.msk.bf16.mxu0 %vm544_vm1, %v543_v4 }
 0x2a3   :  { %v261_v58 = vpop.f32.mrb[4].mxu0 }
 0x2a4   :  { %v262_v59 = vadd.f32 %v261_v58, %v211_v57  ;;  %v488_v60 = vpop.f32.mrb[5].mxu0 }
 0x2a5   :  { %v264_v61 = vpop.f32.mrb[6].mxu0 }
 0x2a6   :  { %v489_v62 = vpop.f32.mrb[7].mxu0  ;;  %267 = vrot.lane.b32.xlu0 %v262_v59, %s545_s29  ;;  %533 = vtanh.f32 %v262_v59 }
 0x2b0   :  { %v534_v63 = vpop.eup %533 }
 0x2b1   :  { %v270_v0 = vmul.f32 1.442695, %v534_v63 }
 0x2b3   :  { %535 = vpow2.f32 %v270_v0 }
 0x2bd   :  { %v536_v1 = vpop.eup %535 }
 0x2be   :  { %v278_v2 = vrot.slane %v536_v1, 7 }
 0x2c0   :  { %v279_v3 = vadd.f32 %v536_v1, %v278_v2 }
 0x2c2   :  { %v280_v5 = vrot.slane %v279_v3, 6 }
 0x2c4   :  { %v281_v6 = vadd.f32 %v280_v5, %v279_v3 }
 0x2c6   :  { %v282_v7 = vsel %vm592_vm3, %v281_v6, 0.0 }
 0x2c7   :  { %v283_v8 = vrot.slane %v282_v7, 1 }
 0x2c9   :  { %v284_v10 = vadd.f32 %v283_v8, %v282_v7 }
 0x2cb   :  { %v285_v12 = vrot.slane %v284_v10, 2 }
 0x2cd   :  { %v286_v13 = vadd.f32 %v285_v12, %v284_v10 }
 0x318   :  { %v268_v9 = vpop.permute.xlu0 %267 }
 0x319   :  { %v441_v11 = vmul.f32 -1.442695, %v268_v9 }
 0x31b   :  { %537 = vpow2.f32 %v441_v11 }
 0x31c   :  { %539 = vrcp.f32 %v286_v13 }
 0x325   :  { %v538_v14 = vpop.eup %537 }
 0x326   :  { %v275_v15 = vadd.f32 1.0, %v538_v14  ;;  %v540_v16 = vpop.eup %539 }
 0x327   :  { %v288_v17 = vmul.f32 %v540_v16, %v536_v1 }
 0x328   :  { %541 = vrcp.f32 %v275_v15 }
 0x329   :  { %v290_v21 = vmul.f32 %v288_v17, %v268_v9 }
 0x332   :  { %v542_v18 = vpop.eup %541 }
 0x333   :  { %v289_v19 = vmul.f32 %v542_v18, %v288_v17  ;;  %v291_v20 = vpack.c.bf16 %v268_v9, %v542_v18 }
 0x335   :  { %491 = vmatpush3.bf16.msra.mxu0 %v291_v20  ;;  %516 = vmatpush3.bf16.msra.mxu1 %v291_v20  ;;  %v292_v22 = vpack.c.bf16 %v290_v21, %v289_v19 }
 0x336   :  { %492 = vmatprep.subr.bf16.mxu0 %v543_v4  ;;  %515 = vmatprep.subr.bf16.mxu1 %v543_v4 }
 0x339   :  { %493 = vmatpush3.bf16.msra.mxu0 %v292_v22  ;;  %517 = vmatpush3.bf16.msra.mxu1 %v292_v22 }
 0x33c   :  { %503 = vmatmul.mubr.msk.bf16.vlgmr.msra.gmra.mrb[4].mxu1 %vm156_vm4, %v528_v23  ;;  %495 = vmatmul.mubr.msk.bf16.vlgmr.msra.gmra.mrb[8].mxu0 %vm156_vm4, %v529_v24 }
 0x33d   :  { %506 = vmatprep.mubr.msk.bf16.mxu1 %vm544_vm1, %v543_v4  ;;  %498 = vmatprep.mubr.msk.bf16.mxu0 %vm544_vm1, %v543_v4 }
 0x344   :  { %507 = vmatmul.mubr.msk.bf16.gmra.mrb[8].mxu1 %vm156_vm4, %v530_v25  ;;  %499 = vmatmul.mubr.msk.bf16.gmra.mrb[12].mxu0 %vm156_vm4, %v531_v26 }
 0x345   :  { %510 = vmatprep.mubr.msk.bf16.mxu1 %vm544_vm1, %v543_v4 }
 0x34c   :  { %511 = vmatmul.mubr.msk.bf16.gmra.mrb[12].mxu1 %vm156_vm4, %v532_v27 }
 0x40f   :  { %v393_v28 = vpop.f32.mrb[4].mxu1  ;;  %v377_v29 = vpop.f32.mrb[8].mxu0 }
 0x410   :  { %420 = vst [vmem:[%s680_s3 + $0x20] sm:$0xff] %v393_v28  ;;  %v504_v30 = vpop.f32.mrb[5].mxu1  ;;  %416 = vst [vmem:[%s680_s3] sm:$0xff] %v377_v29  ;;  %v496_v31 = vpop.f32.mrb[9].mxu0 }
 0x411   :  { %v396_v32 = vpop.f32.mrb[6].mxu1  ;;  %v380_v4 = vpop.f32.mrb[10].mxu0 }
 0x412   :  { %421 = vst [vmem:[%s680_s3 + $0x28] sm:$0xff] %v396_v32  ;;  %v505_v33 = vpop.f32.mrb[7].mxu1  ;;  %417 = vst [vmem:[%s680_s3 + $0x8] sm:$0xff] %v380_v4  ;;  %v497_v34 = vpop.f32.mrb[11].mxu0 }
 0x417   :  { %v401_v35 = vpop.f32.mrb[8].mxu1  ;;  %v385_v36 = vpop.f32.mrb[12].mxu0 }
 0x418   :  { %422 = vst [vmem:[%s680_s3 + $0x30] sm:$0xff] %v401_v35  ;;  %v508_v37 = vpop.f32.mrb[9].mxu1  ;;  %418 = vst [vmem:[%s680_s3 + $0x10] sm:$0xff] %v385_v36  ;;  %v500_v38 = vpop.f32.mrb[13].mxu0 }
 0x419   :  { %v404_v39 = vpop.f32.mrb[10].mxu1  ;;  %v388_v40 = vpop.f32.mrb[14].mxu0 }
 0x41a   :  { %423 = vst [vmem:[%s680_s3 + $0x38] sm:$0xff] %v404_v39  ;;  %v509_v41 = vpop.f32.mrb[11].mxu1  ;;  %419 = vst [vmem:[%s680_s3 + $0x18] sm:$0xff] %v388_v40  ;;  %v501_v42 = vpop.f32.mrb[15].mxu0 }
 0x41f   :  { %v409_v43 = vpop.f32.mrb[12].mxu1 }
 0x420   :  { %424 = vst [vmem:[%s680_s3 + $0x40] sm:$0xff] %v409_v43  ;;  %v512_v44 = vpop.f32.mrb[13].mxu1 }
 0x421   :  { %v412_v45 = vpop.f32.mrb[14].mxu1 }
 0x422   :  { %425 = vst [vmem:[%s680_s3 + $0x48] sm:$0xff] %v412_v45  ;;  %v513_v46 = vpop.f32.mrb[15].mxu1 }

</bundles_post_ra>
